<compile_context>
chip_gen: v5e
topology: v5e:2x2
jax: 0.10.0
libtpu: 0.0.40
codegen_flags: <defaults>
</compile_context>

<pallas_src>
import jax
import jax.numpy as jnp
from jax.experimental import pallas as pl
from jax.experimental.pallas import tpu as pltpu


def _round_up(n, m):
    return ((n + m - 1) // m) * m


def _final_linear_kernel(x_ref, w_ref, b_ref, o_ref):
    # x_ref: (tf, bs, D)   frame-major input tile
    # w_ref: (D, Fp)       resident weight, lane-dense (Fp multiple of 128)
    # b_ref: (1, Fp)       resident bias
    # o_ref: (bs, tf, Fp)  permuted, lane-dense output tile
    w = w_ref[...]
    b = b_ref[...]
    bs = x_ref.shape[1]
    # Static unroll over the (small) batch dim: each iteration is one MXU matmul
    # whose (tf, Fp) result is written straight to the permuted output slab.
    for bi in range(bs):
        xb = x_ref[:, bi, :]  # (tf, D)
        yb = jnp.dot(xb, w, preferred_element_type=jnp.float32) + b
        o_ref[bi, :, :] = yb.astype(o_ref.dtype)


def _choose_frame_tile(nframes, bs, d, f_pad, itemsize=4,
                       vmem_budget=24 * 1024 * 1024, cap=512):
    """Largest frame tile (multiple of 8) that fits a conservative VMEM budget
    (double-buffered x/out tiles + resident weight/bias), then split so the grid
    has >= 2 parallel steps when possible (v7x has 2 TensorCores)."""
    tf = min(cap, _round_up(nframes, 8))
    fixed = 2 * (d * f_pad + f_pad) * itemsize          # weight + bias (double-buffered)
    per_frame = 2 * bs * (d + f_pad) * itemsize          # x tile + out tile, double-buffered
    while tf > 8 and fixed + tf * per_frame > vmem_budget:
        tf = _round_up(tf // 2, 8)
    if tf > 8 and pl.cdiv(nframes, tf) < 2:
        tf = _round_up((nframes + 1) // 2, 8)
    return max(tf, 8)


def _pallas_final_linear(x, w, b, *, tf):
    """x: (nframes, bs, D); w: (D, Fp); b: (1, Fp) -> (bs, nframes, Fp)."""
    nframes, bs, d = x.shape
    _, fp = w.shape
    grid = (pl.cdiv(nframes, tf),)
    cost = pl.CostEstimate(
        flops=2 * nframes * bs * d * fp,
        transcendentals=0,
        bytes_accessed=4 * (nframes * bs * d + d * fp + fp + bs * nframes * fp),
    )
    return pl.pallas_call(
        _final_linear_kernel,
        out_shape=jax.ShapeDtypeStruct((bs, nframes, fp), x.dtype),
        grid_spec=pltpu.PrefetchScalarGridSpec(
            num_scalar_prefetch=0,
            grid=grid,
            in_specs=[
                # (bs, D) = full trailing dims, frame tile on the leading dim.
                pl.BlockSpec((tf, bs, d), lambda i: (i, 0, 0)),
                # weight / bias resident across all grid steps (constant index_map).
                pl.BlockSpec((d, fp), lambda i: (0, 0)),
                pl.BlockSpec((1, fp), lambda i: (0, 0)),
            ],
            # Permute fused here: output block is (bs, tf, Fp) at (0, i, 0).
            out_specs=pl.BlockSpec((bs, tf, fp), lambda i: (0, i, 0)),
        ),
        compiler_params=pltpu.CompilerParams(
            dimension_semantics=("parallel",),
        ),
        cost_estimate=cost,
    )(x, w, b)


class OutputProcess:
    """JAX/Pallas port of the output projection (final_layer Linear + reshape +
    permute(1,0,2)) of MDMDenoiserNetwork."""

    def __init__(self, data_rep, output_feats, latent_dim, *, key):
        self.data_rep = data_rep
        self.input_feats = output_feats
        self.latent_dim = latent_dim
        self.f_pad = _round_up(output_feats, 128)

        # Deterministic init mirroring nn.Linear defaults (uniform +/- 1/sqrt(fan_in)).
        kw, kb = jax.random.split(key)
        bound = 1.0 / (latent_dim ** 0.5)
        # PyTorch stores weight as (out, in); we keep the transposed (in, out) layout.
        self.weight = jax.random.uniform(
            kw, (latent_dim, output_feats), jnp.float32, -bound, bound
        )
        self.bias = jax.random.uniform(
            kb, (1, output_feats), jnp.float32, -bound, bound
        )
        # Lane-dense padded copies used by the kernel (zero-padded columns).
        self.weight_padded = (
            jnp.zeros((latent_dim, self.f_pad), jnp.float32)
            .at[:, :output_feats].set(self.weight)
        )
        self.bias_padded = (
            jnp.zeros((1, self.f_pad), jnp.float32)
            .at[:, :output_feats].set(self.bias)
        )

    def __call__(self, output):
        # output: (nframes, bs, latent_dim) -> (bs, nframes, output_feats)
        nframes, bs, d = output.shape
        assert d == self.latent_dim
        tf = _choose_frame_tile(nframes, bs, d, self.f_pad)
        y = _pallas_final_linear(output, self.weight_padded, self.bias_padded, tf=tf)
        if self.f_pad != self.input_feats:
            y = y[..., : self.input_feats]
        return y


if __name__ == "__main__":
    key = jax.random.PRNGKey(0)
    k_param, k_input = jax.random.split(key)

    # Small shapes consistent with the module (latent_dim lane-dense, F padded 64->128,
    # nframes chosen so the grid has 2 steps and the second frame tile is partial).
    nframes, bs = 200, 2
    latent_dim = 128
    output_feats = 64

    module = OutputProcess("rot6d", output_feats, latent_dim, key=k_param)
    x = jax.random.normal(k_input, (nframes, bs, latent_dim), jnp.float32)

    out = jax.block_until_ready(module(x))

    # Reference: plain JAX linear + reshape + permute(1,0,2).
    ref = jnp.transpose(
        (x.reshape(-1, latent_dim) @ module.weight + module.bias).reshape(
            nframes, bs, output_feats
        ),
        (1, 0, 2),
    )
    assert out.shape == (bs, nframes, output_feats), out.shape
    assert jnp.allclose(out, ref, atol=1e-4, rtol=1e-4), float(
        jnp.max(jnp.abs(out - ref))
    )

    print("KERNEL_OK")
</pallas_src>

<mosaic_0001>
module attributes {stable_mosaic.version = 11 : i64} {
  func.func @_final_linear_kernel(%arg0: i32, %arg1: memref<104x2x128xf32, #tpu.memory_space<vmem>>, %arg2: memref<128x128xf32, #tpu.memory_space<vmem>>, %arg3: memref<1x128xf32, #tpu.memory_space<vmem>>, %arg4: memref<2x104x128xf32, #tpu.memory_space<vmem>>) attributes {dimension_semantics = [#tpu.dimension_semantics<parallel>], iteration_bounds = array<i64: 2>, scalar_prefetch = 0 : i64, scratch_operands = 0 : i64, tpu.core_type = #tpu.core_type<tc>, window_params = [{transform_indices = @transform_0, window_bounds = array<i64: 104, 2, 128>}, {pipeline_mode = #tpu.pipeline_mode<synchronous>, transform_indices = @transform_1, window_bounds = array<i64: 128, 128>}, {pipeline_mode = #tpu.pipeline_mode<synchronous>, transform_indices = @transform_2, window_bounds = array<i64: 1, 128>}, {transform_indices = @transform_3, window_bounds = array<i64: 2, 104, 128>}]} {
    %c0 = arith.constant 0 : index
    %c0_0 = arith.constant 0 : index
    %0 = vector.load %arg2[%c0, %c0_0] : memref<128x128xf32, #tpu.memory_space<vmem>>, vector<128x128xf32>
    %c0_1 = arith.constant 0 : index
    %c0_2 = arith.constant 0 : index
    %1 = vector.load %arg3[%c0_1, %c0_2] : memref<1x128xf32, #tpu.memory_space<vmem>>, vector<1x128xf32>
    %c0_3 = arith.constant 0 : index
    %c0_4 = arith.constant 0 : index
    %c0_5 = arith.constant 0 : index
    %2 = vector.load %arg1[%c0_3, %c0_4, %c0_5] : memref<104x2x128xf32, #tpu.memory_space<vmem>>, vector<104x1x128xf32>
    %3 = vector.shape_cast %2 : vector<104x1x128xf32> to vector<104x128xf32>
    %cst = arith.constant dense<0.000000e+00> : vector<104x128xf32>
    %4 = tpu.matmul %3, %0, %cst {dimension_numbers = #tpu.dot_dimension_numbers<[1], [0], [0], [1], [0, 0, 1, 1], [], []>} : vector<104x128xf32>, vector<128x128xf32>, vector<104x128xf32> -> vector<104x128xf32>
    %5 = vector.broadcast %1 : vector<1x128xf32> to vector<104x128xf32>
    %6 = arith.addf %4, %5 : vector<104x128xf32>
    %c0_6 = arith.constant 0 : index
    %c0_7 = arith.constant 0 : index
    %c0_8 = arith.constant 0 : index
    %7 = vector.load %arg4[%c0_6, %c0_7, %c0_8] : memref<2x104x128xf32, #tpu.memory_space<vmem>>, vector<1x104x128xf32>
    %8 = vector.shape_cast %7 : vector<1x104x128xf32> to vector<104x128xf32>
    %9 = vector.shape_cast %6 : vector<104x128xf32> to vector<1x104x128xf32>
    tpu.vector_store %arg4[%c0_6, %c0_7, %c0_8], %9 {strides = array<i32>} : memref<2x104x128xf32, #tpu.memory_space<vmem>>, vector<1x104x128xf32>,
    %c0_9 = arith.constant 0 : index
    %c1 = arith.constant 1 : index
    %c0_10 = arith.constant 0 : index
    %10 = vector.load %arg1[%c0_9, %c1, %c0_10] : memref<104x2x128xf32, #tpu.memory_space<vmem>>, vector<104x1x128xf32>
    %11 = vector.shape_cast %10 : vector<104x1x128xf32> to vector<104x128xf32>
    %cst_11 = arith.constant dense<0.000000e+00> : vector<104x128xf32>
    %12 = tpu.matmul %11, %0, %cst_11 {dimension_numbers = #tpu.dot_dimension_numbers<[1], [0], [0], [1], [0, 0, 1, 1], [], []>} : vector<104x128xf32>, vector<128x128xf32>, vector<104x128xf32> -> vector<104x128xf32>
    %13 = vector.broadcast %1 : vector<1x128xf32> to vector<104x128xf32>
    %14 = arith.addf %12, %13 : vector<104x128xf32>
    %c1_12 = arith.constant 1 : index
    %c0_13 = arith.constant 0 : index
    %c0_14 = arith.constant 0 : index
    %15 = vector.load %arg4[%c1_12, %c0_13, %c0_14] : memref<2x104x128xf32, #tpu.memory_space<vmem>>, vector<1x104x128xf32>
    %16 = vector.shape_cast %15 : vector<1x104x128xf32> to vector<104x128xf32>
    %17 = vector.shape_cast %14 : vector<104x128xf32> to vector<1x104x128xf32>
    tpu.vector_store %arg4[%c1_12, %c0_13, %c0_14], %17 {strides = array<i32>} : memref<2x104x128xf32, #tpu.memory_space<vmem>>, vector<1x104x128xf32>,
    return
  }
  func.func @transform_0(%arg0: i32) -> (i32, i32, i32) {
    %c0_i32 = arith.constant 0 : i32
    %c0_i32_0 = arith.constant 0 : i32
    %c0_i32_1 = arith.constant 0 : i32
    return %arg0, %c0_i32, %c0_i32_0 : i32, i32, i32
  }
  func.func @transform_1(%arg0: i32) -> (i32, i32) {
    %c0_i32 = arith.constant 0 : i32
    %c0_i32_0 = arith.constant 0 : i32
    %c0_i32_1 = arith.constant 0 : i32
    return %c0_i32, %c0_i32_0 : i32, i32
  }
  func.func @transform_2(%arg0: i32) -> (i32, i32) {
    %c0_i32 = arith.constant 0 : i32
    %c0_i32_0 = arith.constant 0 : i32
    %c0_i32_1 = arith.constant 0 : i32
    return %c0_i32, %c0_i32_0 : i32, i32
  }
  func.func @transform_3(%arg0: i32) -> (i32, i32, i32) {
    %c0_i32 = arith.constant 0 : i32
    %c0_i32_0 = arith.constant 0 : i32
    %c0_i32_1 = arith.constant 0 : i32
    return %c0_i32, %arg0, %c0_i32_0 : i32, i32, i32
  }
}

</mosaic_0001>

<bundles_post_ra>
// kernel: tpu_custom_call.1
= control target key start
LH: loop header
LB: loop body
LE: loop exit
PB: predicated region body
PF: predicated region fallthrough
CT: control target
= control target key end

     0   :  { %8 = vsyncpa [#allocation3], 0  ;;  %s2279_s0 = inlined_call_operand.hbm [shape: f32[200,2,128], index: 0, kind: input, shape index: {}]   ;;  %s2280_s1 = inlined_call_operand.hbm [shape: f32[128,128], index: 1, kind: input, shape index: {}]   ;;  %s2281_s2 = inlined_call_operand.vmem [shape: f32[1,128], index: 2, kind: input, shape index: {}]   ;;  %s2282_s3 = inlined_call_operand.hbm [shape: f32[2,200,128], index: 3, kind: output, shape index: {}]  }
   0x1   :  { %10 = vsyncpa [#allocation3 + $0x1], 0 }
   0x2   :  { %11 = vsyncpa [#allocation6], 0 }
   0x3   :  { %12 = vsyncpa [#allocation4], 0 }
   0x4   :  { %14 = vsyncpa [#allocation4 + $0x1], 0  ;;  %s1603_s12 = smov 0   ;;  %s1605_s13 = smov 0  }
   0x5   :  { %s1607_s14 = smov 0   ;;  %s1609_s15 = smov 0  }
   0x6 LB: > { %s1624_s16 = sadd.s32 4294967295, %s1569_s15   ;;  %s1327_s17 = sadd.s32 4294967294, %s1569_s15   ;;  %s1569_s15 = sphi %s1609_s15, %s2299_s15   ;;  %s1565_s14 = sphi %s1607_s14, %s2298_s14   ;;  %s1561_s13 = sphi %s1605_s13, %s2297_s13   ;;  %s1557_s12 = sphi %s1603_s12, %s2296_s12  }
   0x7   : > { %s1628_s18 = sadd.s32 1, %s1569_s15   ;;  %s27_s19 = sadd.s32 1, %s1565_s14 }
   0x8   : > { %s24_s20 = ssub.s32 %s1569_s15, %s1628_s18  ;;  %p34_p0 = scmp.ne.s32.totalorder %s1565_s14, %s1561_s13 }
   0x9   : > { %p25_p1 = scmp.eq.s32.totalorder %s24_s20, 0  ;;  %p35_p2 = scmp.eq.s32.totalorder %s1569_s15, 0 }
   0xa   : > { %p40_p3 = scmp.ne.s32.totalorder %s1561_s13, %s1557_s12  ;;  %p2284_p4 = scmp.eq.s32.totalorder %s1624_s16, 0 }
   0xb   : > { %s1640_s21 = scalar_select %p25_p1, %s1565_s14, %s27_s19  }
   0xc   : > { %p1642_p5 = por %p35_p2, %p34_p0  ;;  %p1648_p6 = por %p2284_p4, %p40_p3 }
   0xd   : > { %p106_p7 = scmp.eq.s32.totalorder %s1624_s16, 1  ;;  %p112_p8 = scmp.eq.s32.totalorder %s1327_s17, 1 }
   0xe   : > { %p1328_p9 = scmp.ge.s32.totalorder %s1569_s15, 1  ;;  %p119_p10 = scmp.lt.s32.totalorder %s1569_s15, 3 }
   0xf   : > { %p1655_p11 = por %p106_p7, %p34_p0  ;;  %p1659_p12 = por %p112_p8, %p40_p3 }
  0x10   : > { %p1663_p13 = pnand %p1328_p9, %p119_p10  ;;  %s130_s29 = sshll.u32 %s2280_s1, 4  ;;  %s131_s29 = int_to_ptr.hbm [resolvable:$true] %s130_s29 }
  0x11   : > { %s2288_s25 = scalar_select %p1659_p12, 1, 0 }
  0x12   : > { %p1403_p1 = pneg %p1663_p13  ;;  %s1571_s30 = smov [#allocation5]  }
  0x13   : > { %s132_s4 = sshll.u32 %s1571_s30, 4  ;;  %s1572_s5 = smov 128   ;;  %s133_s4 = int_to_ptr.vmem [resolvable:$true] %s132_s4 }
  0x14   : > { %p1404_p0 = pnand %p1403_p1, %p2284_p4  ;;  %s1573_s6 = smov 8  }
  0x15   : > { %p2283_p2 = scmp.ge.s32.totalorder %s1569_s15, 2 }
  0x16   : > { %1406 = dma.hbm_to_vmem [thread:$0]  (!%p1404_p0), %s131_s29, 2048, %s133_s4, [#allocation6], %s1572_s5, %s1572_s5, %s1573_s6  }
  0x17   : > { %145 = sbr.rel (%p2283_p2) target bundleno = 66 (0x42), region = 24 }
  0x1c   : > { %148 = sbr.rel (!%p1642_p5) target bundleno = 66 (0x42), region = 28  ;;  %s149_s7 = sand.u32 (%p1642_p5), 1, %s1565_s14  }
  0x1d   : > { %s154_s8 = smul.u32 (%p1642_p5), 104, %s1569_s15  ;;  %s1684_s20 = scalar_lea.sflag (%p1642_p5), [#allocation3], %s149_s7 }
  0x1e   : > { %s1395_s9 = smul.u32 (%p1642_p5), 208, %s149_s7 }
  0x1f   : > { %s155_s10 = ssub.s32 (%p1642_p5), 200, %s154_s8 }
  0x20   : > { %p156_p3 = scmp.lt.s32.totalorder (%p1642_p5), %s155_s10, 104  ;;  %s153_s27 = scalar_lea.vmem (%p1642_p5), [#allocation2], %s1395_s9 }
  0x22   : > { %s2301_s10 = smov (!%p156_p3, %s155_s10), 104 }
  0x23   : > { %s1331_s11 = sshll.u32 %s2301_s10, 1 }
  0x24   : > { %s159_s17 = ssub.s32 208, %s1331_s11 }
  0x25   : > { %s160_s19 = sshll.u32 %s159_s17, 4 }
  0x26   : > { %161 = vsyncadd %s1684_s20, %s160_s19  ;;  %p1687_p5 = scmp.ne.s32.totalorder %s1331_s11, 0  ;;  %s1359_s28 = smul.u32 208, %s1569_s15 }
  0x27   : > { %s1692_s29 = sshll.u32 %s153_s27, 4  ;;  %s1335_s30 = sshll.u32 %s2301_s10, 5  ;;  %s169_s29 = int_to_ptr.vmem [resolvable:$true] %s1692_s29 }
  0x28   : > { %s164_s6 = scalar_lea.hbm %s2279_s0, %s1359_s28  ;;  %s1490_s9 = sshrl.u32 %s1335_s30, 4 }
  0x29   : > { %s166_s7 = sshll.u32 %s164_s6, 4  ;;  %s1499_s27 = scalar_lea.hbm %s2279_s0, 400  ;;  %s1699_s7 = int_to_ptr.hbm [resolvable:$true] %s166_s7 }
  0x2a   : > { %s1488_s8 = sshra.s32 %s1699_s7, 4  ;;  %s1489_s8 = int_to_ptr.hbm [resolvable:$true] %s1488_s8 }
  0x2b   : > { %s1495_s11 = scalar_lea.hbm %s1489_s8, %s1490_s9  ;;  %p1500_p10 = scmp.lt.s32.totalorder %s1489_s8, %s2279_s0 }
  0x2c   : > { %p1496_p7 = scmp.ne.s32.totalorder %s1489_s8, %s1495_s11  ;;  %p1501_p1 = scmp.lt.s32.totalorder %s1499_s27, %s1495_s11 }
  0x2e   : > { %p1497_p8 = pnand %p1496_p7, %p1687_p5  ;;  %p1502_p0 = por %p1501_p1, %p1500_p10 }
  0x30   : > { %p1498_p9 = pneg %p1497_p8 }
  0x32   : > { %p1503_p3 = pnand %p1502_p0, %p1498_p9 }
  0x34   : > { %1506 = shalt.err (!%p1503_p3)
}
  0x35   : > { %s1507_s5 = sshra.s32 %s169_s29, 4  ;;  %s1574_s17 = smov [#allocation2]   ;;  %s1508_s5 = int_to_ptr.vmem [resolvable:$true] %s1507_s5 }
  0x36   : > { %s1514_s6 = scalar_lea.vmem %s1508_s5, %s1490_s9  ;;  %s1518_s19 = scalar_lea.vmem %s1574_s17, 416 }
  0x37   : > { %p1515_p7 = scmp.ne.s32.totalorder %s1508_s5, %s1514_s6  ;;  %p1520_p4 = scmp.lt.s32.totalorder %s1518_s19, %s1514_s6 }
  0x39   : > { %p1516_p8 = pnand %p1515_p7, %p1687_p5 }
  0x3b   : > { %p1517_p2 = pneg %p1516_p8 }
  0x3d   : > { %p1522_p12 = pnand %p1520_p4, %p1517_p2 }
  0x3f   : > { %1525 = shalt.err (!%p1522_p12)
}
  0x40   : > { %s1575_s8 = smov 32   ;;  %s1576_s11 = smov 2  }
  0x41   : > { %174 = dma.hbm_to_vmem [thread:$0]  (%p1687_p5), %s1699_s7, %s1335_s30, %s169_s29, %s1684_s20, %s1575_s8, %s1575_s8, %s1576_s11  }
  0x42 PF: > { %180 = sbr.rel (%p1663_p13) target bundleno = 338 (0x152), region = 32  ;;  %s1727_s9 = sand.u32 (!%p1663_p13), 1, %s1561_s13  }
  0x43   : > { %s1396_s27 = smul.u32 (!%p1663_p13), 208, %s1727_s9  ;;  %s183_s4 = scalar_lea.sflag (!%p1663_p13), [#allocation3], %s1727_s9 }
  0x45   : > { %s1733_s28 = scalar_lea.vmem (!%p1663_p13), [#allocation2], %s1396_s27 }
  0x47   : > { %1544 = dma.done.wait (%p1648_p6), %s183_s4, 3328  }
  0x48   : > { %1546 = vsyncadd (%p1648_p6), %s183_s4, 4294963968  ;;  %p2291_p4 = scmp.eq.s32.totalorder %s1624_s16, 0 }
  0x4a   : > { %1548 = dma.done.wait (%p2291_p4), [#allocation6], 2048   ;;  %p2292_p12 = pmov %p2291_p4 }
  0x4b   : > { %v240_v0 = vld [vmem:[#allocation5 + $0x78] sm:$0xff]  ;;  %v239_v1 = vld [vmem:[#allocation5 + $0x70] sm:$0xff]  ;;  %v238_v2 = vld [vmem:[#allocation5 + $0x68] sm:$0xff]  ;;  %vm454_vm0 = vcmask 1041409   ;;  %vm457_vm1 = vcmask 1042434   ;;  %vm460_vm2 = vcmask 1043459  }
  0x4c   : > { %1550 = vsyncadd (%p2292_p12), [#allocation6], 4294965248  ;;  %1363 = vmatpush.msra.mxu2 %v240_v0  ;;  %1127 = vmatpush.msra.mxu1 %v240_v0  ;;  %v237_v3 = vld [vmem:[#allocation5 + $0x60] sm:$0xff]  ;;  %v236_v4 = vld [vmem:[#allocation5 + $0x58] sm:$0xff]  ;;  %vm463_vm3 = vcmask 1044484   ;;  %vm466_vm4 = vcmask 1045509  }
  0x4d   : > { %1379 = vmatpush.msra.mxu3 %v240_v0  ;;  %655 = vmatpush.msra.mxu0 %v240_v0  ;;  %v291_v5 = vld [vmem:[%s1733_s28 + $0x62] sm:$0x1]  ;;  %v292_v7 = vld [vmem:[%s1733_s28 + $0x64] sm:$0x1]  ;;  %v293_v8 = vld [vmem:[%s1733_s28 + $0x66] sm:$0x1] }
  0x4e   : > { %1364 = vmatpush.msra.mxu2 %v239_v1  ;;  %1128 = vmatpush.msra.mxu1 %v239_v1  ;;  %v235_v6 = vld [vmem:[#allocation5 + $0x50] sm:$0xff]  ;;  %v294_v9 = vld [vmem:[%s1733_s28 + $0x68] sm:$0x1]  ;;  %v295_v11 = vld [vmem:[%s1733_s28 + $0x6a] sm:$0x1]  ;;  %vm469_vm5 = vcmask 1046534  }
  0x4f   : > { %1380 = vmatpush.msra.mxu3 %v239_v1  ;;  %656 = vmatpush.msra.mxu0 %v239_v1  ;;  %v290_v10 = vld [vmem:[%s1733_s28 + $0x60] sm:$0x1]  ;;  %v1750_v12 = vld [vmem:[%s1733_s28 + $0x6c] sm:$0x1]  ;;  %v1753_v14 = vld [vmem:[%s1733_s28 + $0x6e] sm:$0x1] }
  0x50   : > { %1365 = vmatpush.msra.mxu2 %v238_v2  ;;  %1129 = vmatpush.msra.mxu1 %v238_v2  ;;  %v234_v13 = vld [vmem:[#allocation5 + $0x48] sm:$0xff]  ;;  %v544_v15 = vrot.slane %v291_v5, 7  ;;  %v546_v16 = vrot.slane %v292_v7, 6  ;;  %v548_v17 = vrot.slane %v293_v8, 5  ;;  %v550_v18 = vrot.slane %v294_v9, 4  ;;  %v233_v22 = vld [vmem:[#allocation5 + $0x40] sm:$0xff] }
  0x51   : > { %1381 = vmatpush.msra.mxu3 %v238_v2  ;;  %657 = vmatpush.msra.mxu0 %v238_v2  ;;  %v552_v19 = vrot.slane %v295_v11, 3  ;;  %v724_v20 = vld [vmem:[%s1733_s28 + $0x1] sm:$0x1]  ;;  %v725_v21 = vld [vmem:[%s1733_s28 + $0x3] sm:$0x1]  ;;  %vm472_vm6 = vcmask 1047559  }
  0x52   : > { %1366 = vmatpush.msra.mxu2 %v237_v3  ;;  %1130 = vmatpush.msra.mxu1 %v237_v3  ;;  %v545_v23 = vsel %vm454_vm0, %v544_v15, %v290_v10  ;;  %v726_v24 = vld [vmem:[%s1733_s28 + $0x5] sm:$0x1]  ;;  %v727_v25 = vld [vmem:[%s1733_s28 + $0x7] sm:$0x1]  ;;  %v728_v26 = vld [vmem:[%s1733_s28 + $0x9] sm:$0x1] }
  0x53   : > { %1382 = vmatpush.msra.mxu3 %v237_v3  ;;  %658 = vmatpush.msra.mxu0 %v237_v3  ;;  %v547_v27 = vsel %vm457_vm1, %v546_v16, %v545_v23  ;;  %v554_v28 = vrot.slane %v1750_v12, 2  ;;  %v556_v29 = vrot.slane %v1753_v14, 1  ;;  %v729_v30 = vld [vmem:[%s1733_s28 + $0xb] sm:$0x1]  ;;  %v1766_v31 = vld [vmem:[%s1733_s28 + $0xd] sm:$0x1] }
  0x54   : > { %1367 = vmatpush.msra.mxu2 %v236_v4  ;;  %1131 = vmatpush.msra.mxu1 %v236_v4  ;;  %v232_v32 = vld [vmem:[#allocation5 + $0x38] sm:$0xff]  ;;  %v549_v33 = vsel %vm460_vm2, %v548_v17, %v547_v27  ;;  %v932_v35 = vrot.slane %v725_v21, 7  ;;  %v934_v36 = vrot.slane %v726_v24, 6  ;;  %v936_v37 = vrot.slane %v727_v25, 5  ;;  %v298_v41 = vld [vmem:[%s1733_s28 + $0x70] sm:$0x1] }
  0x55   : > { %1383 = vmatpush.msra.mxu3 %v236_v4  ;;  %659 = vmatpush.msra.mxu0 %v236_v4  ;;  %v1770_v34 = vld [vmem:[%s1733_s28 + $0xf] sm:$0x1]  ;;  %v551_v38 = vsel %vm463_vm3, %v550_v18, %v549_v33  ;;  %v938_v39 = vrot.slane %v728_v26, 4  ;;  %v940_v40 = vrot.slane %v729_v30, 3  ;;  %v299_v42 = vld [vmem:[%s1733_s28 + $0x72] sm:$0x1] }
  0x56   : > { %1368 = vmatpush.msra.mxu2 %v235_v6  ;;  %1132 = vmatpush.msra.mxu1 %v235_v6  ;;  %v933_v43 = vsel %vm454_vm0, %v932_v35, %v724_v20  ;;  %v942_v44 = vrot.slane %v1766_v31, 2  ;;  %v300_v45 = vld [vmem:[%s1733_s28 + $0x74] sm:$0x1]  ;;  %v301_v46 = vld [vmem:[%s1733_s28 + $0x76] sm:$0x1]  ;;  %v558_v47 = vrot.slane %v299_v42, 7  ;;  %v553_v48 = vsel %vm466_vm4, %v552_v19, %v551_v38 }
  0x57   : > { %1384 = vmatpush.msra.mxu3 %v235_v6  ;;  %660 = vmatpush.msra.mxu0 %v235_v6  ;;  %v935_v49 = vsel %vm457_vm1, %v934_v36, %v933_v43  ;;  %v302_v50 = vld [vmem:[%s1733_s28 + $0x78] sm:$0x1]  ;;  %v303_v51 = vld [vmem:[%s1733_s28 + $0x7a] sm:$0x1]  ;;  %v1784_v52 = vld [vmem:[%s1733_s28 + $0x7c] sm:$0x1]  ;;  %v555_v7 = vsel %vm469_vm5, %v554_v28, %v553_v48 }
  0x58   : > { %1369 = vmatpush.msra.mxu2 %v234_v13  ;;  %1133 = vmatpush.msra.mxu1 %v234_v13  ;;  %v231_v53 = vld [vmem:[#allocation5 + $0x30] sm:$0xff]  ;;  %v230_v54 = vld [vmem:[#allocation5 + $0x28] sm:$0xff]  ;;  %v937_v55 = vsel %vm460_vm2, %v936_v37, %v935_v49  ;;  %v944_v56 = vrot.slane %v1770_v34, 1  ;;  %v559_v58 = vsel %vm454_vm0, %v558_v47, %v298_v41  ;;  %v560_v59 = vrot.slane %v300_v45, 6  ;;  %v229_v1 = vld [vmem:[#allocation5 + $0x20] sm:$0xff]  ;;  %s2184_s10 = scalar_lea.vmem [#allocation7], %s1396_s27 }
  0x59   : > { %1385 = vmatpush.msra.mxu3 %v234_v13  ;;  %661 = vmatpush.msra.mxu0 %v234_v13  ;;  %v1789_v57 = vld [vmem:[%s1733_s28 + $0x7e] sm:$0x1]  ;;  %v939_v60 = vsel %vm463_vm3, %v938_v39, %v937_v55  ;;  %v562_v61 = vrot.slane %v301_v46, 5  ;;  %v564_v62 = vrot.slane %v302_v50, 4  ;;  %v780_v63 = vld [vmem:[%s1733_s28 + $0x71] sm:$0x1]  ;;  %v1817_v24 = vsel %vm472_vm6, %v556_v29, %v555_v7 }
  0x5a   : > { %1370 = vmatpush.msra.mxu2 %v233_v22  ;;  %1134 = vmatpush.msra.mxu1 %v233_v22  ;;  %v781_v0 = vld [vmem:[%s1733_s28 + $0x73] sm:$0x1]  ;;  %v561_v2 = vsel %vm457_vm1, %v560_v59, %v559_v58  ;;  %v566_v3 = vrot.slane %v303_v51, 3  ;;  %v568_v4 = vrot.slane %v1784_v52, 2  ;;  %v782_v5 = vld [vmem:[%s1733_s28 + $0x75] sm:$0x1]  ;;  %v941_v8 = vsel %vm466_vm4, %v940_v40, %v939_v60 }
  0x5b   : > { %1386 = vmatpush.msra.mxu3 %v233_v22  ;;  %662 = vmatpush.msra.mxu0 %v233_v22  ;;  %v783_v6 = vld [vmem:[%s1733_s28 + $0x77] sm:$0x1]  ;;  %v563_v9 = vsel %vm460_vm2, %v562_v61, %v561_v2  ;;  %v784_v10 = vld [vmem:[%s1733_s28 + $0x79] sm:$0x1]  ;;  %v785_v11 = vld [vmem:[%s1733_s28 + $0x7b] sm:$0x1] }
  0x5c   : > { %1371 = vmatpush.msra.mxu2 %v232_v32  ;;  %1135 = vmatpush.msra.mxu1 %v232_v32  ;;  %v1805_v12 = vld [vmem:[%s1733_s28 + $0x7d] sm:$0x1]  ;;  %v565_v15 = vsel %vm463_vm3, %v564_v62, %v563_v9  ;;  %v570_v16 = vrot.slane %v1789_v57, 1  ;;  %v1810_v17 = vld [vmem:[%s1733_s28 + $0x7f] sm:$0x1]  ;;  %v1030_v18 = vrot.slane %v781_v0, 7 }
  0x5d   : > { %1387 = vmatpush.msra.mxu3 %v232_v32  ;;  %663 = vmatpush.msra.mxu0 %v232_v32  ;;  %v228_v13 = vld [vmem:[#allocation5 + $0x18] sm:$0xff]  ;;  %v1032_v19 = vrot.slane %v782_v5, 6  ;;  %v1034_v20 = vrot.slane %v783_v6, 5  ;;  %v1036_v21 = vrot.slane %v784_v10, 4  ;;  %v242_v22 = vld [vmem:[%s1733_s28] sm:$0x1]  ;;  %v943_v32 = vsel %vm469_vm5, %v942_v44, %v941_v8 }
  0x5e   : > { %1372 = vmatpush.msra.mxu2 %v231_v53  ;;  %1136 = vmatpush.msra.mxu1 %v231_v53  ;;  %v243_v23 = vld [vmem:[%s1733_s28 + $0x2] sm:$0x1]  ;;  %v1031_v25 = vsel %vm454_vm0, %v1030_v18, %v780_v63  ;;  %v1038_v26 = vrot.slane %v785_v11, 3  ;;  %v1040_v27 = vrot.slane %v1805_v12, 2  ;;  %v244_v28 = vld [vmem:[%s1733_s28 + $0x4] sm:$0x1]  ;;  %v567_v14 = vsel %vm466_vm4, %v566_v3, %v565_v15 }
  0x5f   : > { %1388 = vmatpush.msra.mxu3 %v231_v53  ;;  %664 = vmatpush.msra.mxu0 %v231_v53  ;;  %v245_v30 = vld [vmem:[%s1733_s28 + $0x6] sm:$0x1]  ;;  %v1033_v29 = vsel %vm457_vm1, %v1032_v19, %v1031_v25  ;;  %v246_v33 = vld [vmem:[%s1733_s28 + $0x8] sm:$0x1]  ;;  %v247_v35 = vld [vmem:[%s1733_s28 + $0xa] sm:$0x1]  ;;  %v945_v58 = vsel %vm472_vm6, %v944_v56, %v943_v32  ;;  %v569_v59 = vsel %vm469_vm5, %v568_v4, %v567_v14 }
  0x60   : > { %1373 = vmatpush.msra.mxu2 %v230_v54  ;;  %1137 = vmatpush.msra.mxu1 %v230_v54  ;;  %v248_v36 = vld [vmem:[%s1733_s28 + $0xc] sm:$0x1]  ;;  %v227_v37 = vld [vmem:[#allocation5 + $0x10] sm:$0xff]  ;;  %v1035_v38 = vsel %vm460_vm2, %v1034_v20, %v1033_v29  ;;  %v1833_v39 = vld [vmem:[%s1733_s28 + $0xe] sm:$0x1]  ;;  %v453_v40 = vrot.slane %v243_v23, 7 }
  0x61   : > { %1389 = vmatpush.msra.mxu3 %v230_v54  ;;  %665 = vmatpush.msra.mxu0 %v230_v54  ;;  %v456_v41 = vrot.slane %v244_v28, 6  ;;  %v459_v31 = vrot.slane %v245_v30, 5  ;;  %v226_v42 = vld [vmem:[#allocation5 + $0x8] sm:$0xff]  ;;  %v1037_v43 = vsel %vm463_vm3, %v1036_v21, %v1035_v38  ;;  %v1042_v44 = vrot.slane %v1810_v17, 1  ;;  %v732_v47 = vld [vmem:[%s1733_s28 + $0x11] sm:$0x1] }
  0x62   : > { %1374 = vmatpush.msra.mxu2 %v229_v1  ;;  %1138 = vmatpush.msra.mxu1 %v229_v1  ;;  %v462_v45 = vrot.slane %v246_v33, 4  ;;  %v465_v46 = vrot.slane %v247_v35, 3  ;;  %v225_v48 = vld [vmem:[#allocation5] sm:$0xff]  ;;  %v1039_v49 = vsel %vm466_vm4, %v1038_v26, %v1037_v43  ;;  %v455_v50 = vsel %vm454_vm0, %v453_v40, %v242_v22  ;;  %v736_v62 = vld [vmem:[%s1733_s28 + $0x19] sm:$0x1]  ;;  %s1198_s20 = scalar_lea.sflag [#allocation4], %s1727_s9 }
  0x63   : > { %1390 = vmatpush.msra.mxu3 %v229_v1  ;;  %666 = vmatpush.msra.mxu0 %v229_v1  ;;  %v468_v51 = vrot.slane %v248_v36, 2  ;;  %v471_v53 = vrot.slane %v1833_v39, 1  ;;  %v733_v54 = vld [vmem:[%s1733_s28 + $0x13] sm:$0x1]  ;;  %v734_v55 = vld [vmem:[%s1733_s28 + $0x15] sm:$0x1]  ;;  %v458_v60 = vsel %vm457_vm1, %v456_v41, %v455_v50  ;;  %v1041_v0 = vsel %vm469_vm5, %v1040_v27, %v1039_v49 }
  0x64   : > { %1375 = vmatpush.msra.mxu2 %v228_v13  ;;  %1139 = vmatpush.msra.mxu1 %v228_v13  ;;  %v735_v61 = vld [vmem:[%s1733_s28 + $0x17] sm:$0x1]  ;;  %v737_v63 = vld [vmem:[%s1733_s28 + $0x1b] sm:$0x1]  ;;  %v461_v1 = vsel %vm460_vm2, %v459_v31, %v458_v60  ;;  %v738_v2 = vld [vmem:[%s1733_s28 + $0x1d] sm:$0x1]  ;;  %v1043_v15 = vsel %vm472_vm6, %v1042_v44, %v1041_v0  ;;  %v571_v40 = vsel %vm472_vm6, %v570_v16, %v569_v59 }
  0x65   : > { %1391 = vmatpush.msra.mxu3 %v228_v13  ;;  %667 = vmatpush.msra.mxu0 %v228_v13  ;;  %v739_v34 = vld [vmem:[%s1733_s28 + $0x1f] sm:$0x1]  ;;  %v946_v56 = vrot.slane %v733_v54, 7  ;;  %v948_v52 = vrot.slane %v734_v55, 6  ;;  %v464_v3 = vsel %vm463_vm3, %v462_v45, %v461_v1  ;;  %v950_v4 = vrot.slane %v735_v61, 5 }
  0x66   : > { %1376 = vmatpush.msra.mxu2 %v227_v37  ;;  %1140 = vmatpush.msra.mxu1 %v227_v37  ;;  %v952_v5 = vrot.slane %v736_v62, 4  ;;  %v954_v6 = vrot.slane %v737_v63, 3  ;;  %v306_v7 = vld [vmem:[%s1733_s28 + $0x80] sm:$0x1]  ;;  %v467_v8 = vsel %vm466_vm4, %v465_v46, %v464_v3  ;;  %v956_v10 = vrot.slane %v738_v2, 2 }
  0x67   : > { %1392 = vmatpush.msra.mxu3 %v227_v37  ;;  %668 = vmatpush.msra.mxu0 %v227_v37  ;;  %v947_v9 = vsel %vm454_vm0, %v946_v56, %v732_v47  ;;  %v958_v11 = vrot.slane %v739_v34, 1  ;;  %v307_v12 = vld [vmem:[%s1733_s28 + $0x82] sm:$0x1]  ;;  %v308_v13 = vld [vmem:[%s1733_s28 + $0x84] sm:$0x1]  ;;  %v470_v17 = vsel %vm469_vm5, %v468_v51, %v467_v8 }
  0x68   : > { %1377 = vmatpush.msra.mxu2 %v226_v42  ;;  %1141 = vmatpush.msra.mxu1 %v226_v42  ;;  %v949_v18 = vsel %vm457_vm1, %v948_v52, %v947_v9  ;;  %v309_v19 = vld [vmem:[%s1733_s28 + $0x86] sm:$0x1]  ;;  %v310_v20 = vld [vmem:[%s1733_s28 + $0x88] sm:$0x1]  ;;  %v311_v21 = vld [vmem:[%s1733_s28 + $0x8a] sm:$0x1]  ;;  %v473_v22 = vsel %vm472_vm6, %v471_v53, %v470_v17 }
  0x69   : > { %1393 = vmatpush.msra.mxu3 %v226_v42  ;;  %669 = vmatpush.msra.mxu0 %v226_v42  ;;  %v951_v23 = vsel %vm460_vm2, %v950_v4, %v949_v18  ;;  %v312_v25 = vld [vmem:[%s1733_s28 + $0x8c] sm:$0x1]  ;;  %v1874_v26 = vld [vmem:[%s1733_s28 + $0x8e] sm:$0x1]  ;;  %v572_v27 = vrot.slane %v307_v12, 7  ;;  %v574_v28 = vrot.slane %v308_v13, 6 }
  0x6a   : > { %1378 = vmatpush.msra.mxu2 %v225_v48  ;;  %1142 = vmatpush.msra.mxu1 %v225_v48  ;;  %v953_v30 = vsel %vm463_vm3, %v952_v5, %v951_v23  ;;  %v576_v32 = vrot.slane %v309_v19, 5  ;;  %v580_v14 = vrot.slane %v311_v21, 3  ;;  %v788_v29 = vld [vmem:[%s1733_s28 + $0x81] sm:$0x1]  ;;  %v582_v36 = vrot.slane %v312_v25, 2 }
  0x6b   : > { %689 = vmatmul.f32.vlgmr.msra.gmra.mxu2 %v1817_v24  ;;  %1143 = vmatmul.f32.vlgmr.msra.gmra.mxu1 %v945_v58  ;;  %v578_v24 = vrot.slane %v310_v20, 4  ;;  %v955_v33 = vsel %vm466_vm4, %v954_v6, %v953_v30  ;;  %v573_v35 = vsel %vm454_vm0, %v572_v27, %v306_v7  ;;  %v584_v37 = vrot.slane %v1874_v26, 1  ;;  %v789_v38 = vld [vmem:[%s1733_s28 + $0x83] sm:$0x1]  ;;  %v790_v39 = vld [vmem:[%s1733_s28 + $0x85] sm:$0x1] }
  0x6c   : > { %1394 = vmatpush.msra.mxu3 %v225_v48  ;;  %670 = vmatpush.msra.mxu0 %v225_v48  ;;  %v957_v41 = vsel %vm469_vm5, %v956_v10, %v955_v33  ;;  %v575_v31 = vsel %vm457_vm1, %v574_v28, %v573_v35  ;;  %v791_v42 = vld [vmem:[%s1733_s28 + $0x87] sm:$0x1]  ;;  %v792_v43 = vld [vmem:[%s1733_s28 + $0x89] sm:$0x1]  ;;  %v793_v44 = vld [vmem:[%s1733_s28 + $0x8b] sm:$0x1] }
  0x6d   : > { %1164 = vmatmul.f32.vlgmr.msra.gmra.mxu3 %v1043_v15  ;;  %671 = vmatmul.f32.vlgmr.msra.gmra.mxu0 %v473_v22  ;;  %v959_v45 = vsel %vm472_vm6, %v958_v11, %v957_v41  ;;  %v577_v46 = vsel %vm460_vm2, %v576_v32, %v575_v31  ;;  %v794_v47 = vld [vmem:[%s1733_s28 + $0x8d] sm:$0x1]  ;;  %v795_v48 = vld [vmem:[%s1733_s28 + $0x8f] sm:$0x1]  ;;  %v1044_v57 = vrot.slane %v789_v38, 7  ;;  %v1046_v16 = vrot.slane %v790_v39, 6 }
  0x6e   : > { %v579_v49 = vsel %vm463_vm3, %v578_v24, %v577_v46  ;;  %v1048_v50 = vrot.slane %v791_v42, 5  ;;  %v1050_v51 = vrot.slane %v792_v43, 4  ;;  %v1052_v53 = vrot.slane %v793_v44, 3  ;;  %v250_v54 = vld [vmem:[%s1733_s28 + $0x10] sm:$0x1] }
  0x6f   : > { %v581_v55 = vsel %vm466_vm4, %v580_v14, %v579_v49  ;;  %v1045_v58 = vsel %vm454_vm0, %v1044_v57, %v788_v29  ;;  %v1054_v59 = vrot.slane %v794_v47, 2  ;;  %v1056_v60 = vrot.slane %v795_v48, 1  ;;  %v251_v61 = vld [vmem:[%s1733_s28 + $0x12] sm:$0x1]  ;;  %v252_v62 = vld [vmem:[%s1733_s28 + $0x14] sm:$0x1] }
  0x70   : > { %v1047_v63 = vsel %vm457_vm1, %v1046_v16, %v1045_v58  ;;  %v253_v0 = vld [vmem:[%s1733_s28 + $0x16] sm:$0x1]  ;;  %v254_v1 = vld [vmem:[%s1733_s28 + $0x18] sm:$0x1]  ;;  %v255_v2 = vld [vmem:[%s1733_s28 + $0x1a] sm:$0x1]  ;;  %v583_v34 = vsel %vm469_vm5, %v582_v36, %v581_v55 }
  0x71   : > { %v1049_v56 = vsel %vm460_vm2, %v1048_v50, %v1047_v63  ;;  %v256_v52 = vld [vmem:[%s1733_s28 + $0x1c] sm:$0x1]  ;;  %v257_v3 = vld [vmem:[%s1733_s28 + $0x1e] sm:$0x1]  ;;  %v474_v4 = vrot.slane %v251_v61, 7  ;;  %v476_v5 = vrot.slane %v252_v62, 6  ;;  %v585_v19 = vsel %vm472_vm6, %v584_v37, %v583_v34 }
  0x72   : > { %v1051_v6 = vsel %vm463_vm3, %v1050_v51, %v1049_v56  ;;  %v478_v7 = vrot.slane %v253_v0, 5  ;;  %v480_v8 = vrot.slane %v254_v1, 4  ;;  %v482_v9 = vrot.slane %v255_v2, 3  ;;  %v740_v10 = vld [vmem:[%s1733_s28 + $0x21] sm:$0x1] }
  0x73   : > { %692 = vmatmul.f32.gmra.mxu2 %v571_v40  ;;  %1146 = vmatmul.f32.gmra.mxu1 %v959_v45  ;;  %v1053_v11 = vsel %vm466_vm4, %v1052_v53, %v1051_v6  ;;  %v475_v12 = vsel %vm454_vm0, %v474_v4, %v250_v54  ;;  %v484_v13 = vrot.slane %v256_v52, 2  ;;  %v486_v15 = vrot.slane %v257_v3, 1  ;;  %v741_v17 = vld [vmem:[%s1733_s28 + $0x23] sm:$0x1]  ;;  %v742_v18 = vld [vmem:[%s1733_s28 + $0x25] sm:$0x1] }
  0x74   : > { %v1055_v20 = vsel %vm469_vm5, %v1054_v59, %v1053_v11  ;;  %v477_v21 = vsel %vm457_vm1, %v476_v5, %v475_v12  ;;  %v743_v22 = vld [vmem:[%s1733_s28 + $0x27] sm:$0x1]  ;;  %v744_v23 = vld [vmem:[%s1733_s28 + $0x29] sm:$0x1]  ;;  %v745_v25 = vld [vmem:[%s1733_s28 + $0x2b] sm:$0x1] }
  0x75   : > { %v1057_v26 = vsel %vm472_vm6, %v1056_v60, %v1055_v20  ;;  %v479_v27 = vsel %vm460_vm2, %v478_v7, %v477_v21  ;;  %v746_v28 = vld [vmem:[%s1733_s28 + $0x2d] sm:$0x1]  ;;  %v747_v30 = vld [vmem:[%s1733_s28 + $0x2f] sm:$0x1]  ;;  %v960_v32 = vrot.slane %v741_v17, 7  ;;  %v962_v24 = vrot.slane %v742_v18, 6 }
  0x76   : > { %1167 = vmatmul.f32.gmra.mxu3 %v1057_v26  ;;  %v481_v14 = vsel %vm463_vm3, %v480_v8, %v479_v27  ;;  %v964_v29 = vrot.slane %v743_v22, 5  ;;  %v966_v33 = vrot.slane %v744_v23, 4  ;;  %v968_v35 = vrot.slane %v745_v25, 3  ;;  %v314_v36 = vld [vmem:[%s1733_s28 + $0x90] sm:$0x1] }
  0x77   : > { %v483_v37 = vsel %vm466_vm4, %v482_v9, %v481_v14  ;;  %v961_v38 = vsel %vm454_vm0, %v960_v32, %v740_v10  ;;  %v970_v39 = vrot.slane %v746_v28, 2  ;;  %v972_v40 = vrot.slane %v747_v30, 1  ;;  %v315_v41 = vld [vmem:[%s1733_s28 + $0x92] sm:$0x1]  ;;  %v316_v31 = vld [vmem:[%s1733_s28 + $0x94] sm:$0x1] }
  0x78   : > { %v485_v42 = vsel %vm469_vm5, %v484_v13, %v483_v37  ;;  %v963_v43 = vsel %vm457_vm1, %v962_v24, %v961_v38  ;;  %v317_v44 = vld [vmem:[%s1733_s28 + $0x96] sm:$0x1]  ;;  %v318_v45 = vld [vmem:[%s1733_s28 + $0x98] sm:$0x1]  ;;  %v319_v46 = vld [vmem:[%s1733_s28 + $0x9a] sm:$0x1] }
  0x79   : > { %v487_v47 = vsel %vm472_vm6, %v486_v15, %v485_v42  ;;  %v965_v48 = vsel %vm460_vm2, %v964_v29, %v963_v43  ;;  %v320_v57 = vld [vmem:[%s1733_s28 + $0x9c] sm:$0x1]  ;;  %v321_v16 = vld [vmem:[%s1733_s28 + $0x9e] sm:$0x1]  ;;  %v586_v49 = vrot.slane %v315_v41, 7  ;;  %v588_v50 = vrot.slane %v316_v31, 6 }
  0x7a   : > { %674 = vmatmul.f32.gmra.mxu0 %v487_v47  ;;  %v967_v51 = vsel %vm463_vm3, %v966_v33, %v965_v48  ;;  %v590_v53 = vrot.slane %v317_v44, 5  ;;  %v592_v54 = vrot.slane %v318_v45, 4  ;;  %v594_v55 = vrot.slane %v319_v46, 3  ;;  %v796_v58 = vld [vmem:[%s1733_s28 + $0x91] sm:$0x1] }
  0x7b   : > { %695 = vmatmul.f32.gmra.mxu2 %v585_v19  ;;  %v969_v59 = vsel %vm466_vm4, %v968_v35, %v967_v51  ;;  %v587_v60 = vsel %vm454_vm0, %v586_v49, %v314_v36  ;;  %v596_v61 = vrot.slane %v320_v57, 2  ;;  %v598_v62 = vrot.slane %v321_v16, 1  ;;  %v797_v63 = vld [vmem:[%s1733_s28 + $0x93] sm:$0x1]  ;;  %v798_v0 = vld [vmem:[%s1733_s28 + $0x95] sm:$0x1] }
  0x7c   : > { %v971_v1 = vsel %vm469_vm5, %v970_v39, %v969_v59  ;;  %v589_v2 = vsel %vm457_vm1, %v588_v50, %v587_v60  ;;  %v799_v34 = vld [vmem:[%s1733_s28 + $0x97] sm:$0x1]  ;;  %v800_v56 = vld [vmem:[%s1733_s28 + $0x99] sm:$0x1]  ;;  %v801_v52 = vld [vmem:[%s1733_s28 + $0x9b] sm:$0x1] }
  0x7d   : > { %v973_v3 = vsel %vm472_vm6, %v972_v40, %v971_v1  ;;  %v591_v4 = vsel %vm460_vm2, %v590_v53, %v589_v2  ;;  %v802_v5 = vld [vmem:[%s1733_s28 + $0x9d] sm:$0x1]  ;;  %v803_v6 = vld [vmem:[%s1733_s28 + $0x9f] sm:$0x1]  ;;  %v1058_v7 = vrot.slane %v797_v63, 7  ;;  %v1060_v8 = vrot.slane %v798_v0, 6 }
  0x7e   : > { %1149 = vmatmul.f32.gmra.mxu1 %v973_v3  ;;  %v593_v9 = vsel %vm463_vm3, %v592_v54, %v591_v4  ;;  %v1062_v10 = vrot.slane %v799_v34, 5  ;;  %v1064_v11 = vrot.slane %v800_v56, 4  ;;  %v1066_v12 = vrot.slane %v801_v52, 3  ;;  %v258_v13 = vld [vmem:[%s1733_s28 + $0x20] sm:$0x1] }
  0x7f   : > { %v595_v15 = vsel %vm466_vm4, %v594_v55, %v593_v9  ;;  %v1059_v17 = vsel %vm454_vm0, %v1058_v7, %v796_v58  ;;  %v1068_v18 = vrot.slane %v802_v5, 2  ;;  %v1070_v19 = vrot.slane %v803_v6, 1  ;;  %v259_v20 = vld [vmem:[%s1733_s28 + $0x22] sm:$0x1]  ;;  %v260_v21 = vld [vmem:[%s1733_s28 + $0x24] sm:$0x1] }
  0x80   : > { %v597_v22 = vsel %vm469_vm5, %v596_v61, %v595_v15  ;;  %v1061_v23 = vsel %vm457_vm1, %v1060_v8, %v1059_v17  ;;  %v261_v25 = vld [vmem:[%s1733_s28 + $0x26] sm:$0x1]  ;;  %v262_v26 = vld [vmem:[%s1733_s28 + $0x28] sm:$0x1]  ;;  %v263_v27 = vld [vmem:[%s1733_s28 + $0x2a] sm:$0x1] }
  0x81   : > { %v599_v28 = vsel %vm472_vm6, %v598_v62, %v597_v22  ;;  %v1063_v30 = vsel %vm460_vm2, %v1062_v10, %v1061_v23  ;;  %v264_v32 = vld [vmem:[%s1733_s28 + $0x2c] sm:$0x1]  ;;  %v265_v24 = vld [vmem:[%s1733_s28 + $0x2e] sm:$0x1]  ;;  %v488_v14 = vrot.slane %v259_v20, 7  ;;  %v490_v29 = vrot.slane %v260_v21, 6 }
  0x82   : > { %v1065_v33 = vsel %vm463_vm3, %v1064_v11, %v1063_v30  ;;  %v492_v35 = vrot.slane %v261_v25, 5  ;;  %v494_v36 = vrot.slane %v262_v26, 4  ;;  %v496_v37 = vrot.slane %v263_v27, 3  ;;  %v748_v38 = vld [vmem:[%s1733_s28 + $0x31] sm:$0x1] }
  0x83   : > { %698 = vmatmul.f32.gmra.mxu2 %v599_v28  ;;  %v1067_v39 = vsel %vm466_vm4, %v1066_v12, %v1065_v33  ;;  %v489_v40 = vsel %vm454_vm0, %v488_v14, %v258_v13  ;;  %v498_v41 = vrot.slane %v264_v32, 2  ;;  %v500_v31 = vrot.slane %v265_v24, 1  ;;  %v749_v42 = vld [vmem:[%s1733_s28 + $0x33] sm:$0x1]  ;;  %v750_v43 = vld [vmem:[%s1733_s28 + $0x35] sm:$0x1] }
  0x84   : > { %v1069_v44 = vsel %vm469_vm5, %v1068_v18, %v1067_v39  ;;  %v491_v45 = vsel %vm457_vm1, %v490_v29, %v489_v40  ;;  %v751_v46 = vld [vmem:[%s1733_s28 + $0x37] sm:$0x1]  ;;  %v752_v47 = vld [vmem:[%s1733_s28 + $0x39] sm:$0x1]  ;;  %v753_v48 = vld [vmem:[%s1733_s28 + $0x3b] sm:$0x1] }
  0x85   : > { %v1071_v57 = vsel %vm472_vm6, %v1070_v19, %v1069_v44  ;;  %v493_v16 = vsel %vm460_vm2, %v492_v35, %v491_v45  ;;  %v754_v49 = vld [vmem:[%s1733_s28 + $0x3d] sm:$0x1]  ;;  %v755_v50 = vld [vmem:[%s1733_s28 + $0x3f] sm:$0x1]  ;;  %v974_v51 = vrot.slane %v749_v42, 7  ;;  %v976_v53 = vrot.slane %v750_v43, 6 }
  0x86   : > { %1170 = vmatmul.f32.gmra.mxu3 %v1071_v57  ;;  %v495_v54 = vsel %vm463_vm3, %v494_v36, %v493_v16  ;;  %v978_v55 = vrot.slane %v751_v46, 5  ;;  %v980_v58 = vrot.slane %v752_v47, 4  ;;  %v982_v59 = vrot.slane %v753_v48, 3  ;;  %v322_v60 = vld [vmem:[%s1733_s28 + $0xa0] sm:$0x1] }
  0x87   : > { %v497_v61 = vsel %vm466_vm4, %v496_v37, %v495_v54  ;;  %v975_v62 = vsel %vm454_vm0, %v974_v51, %v748_v38  ;;  %v984_v63 = vrot.slane %v754_v49, 2  ;;  %v986_v0 = vrot.slane %v755_v50, 1  ;;  %v323_v1 = vld [vmem:[%s1733_s28 + $0xa2] sm:$0x1]  ;;  %v324_v2 = vld [vmem:[%s1733_s28 + $0xa4] sm:$0x1] }
  0x88   : > { %v499_v34 = vsel %vm469_vm5, %v498_v41, %v497_v61  ;;  %v977_v56 = vsel %vm457_vm1, %v976_v53, %v975_v62  ;;  %v325_v52 = vld [vmem:[%s1733_s28 + $0xa6] sm:$0x1]  ;;  %v326_v3 = vld [vmem:[%s1733_s28 + $0xa8] sm:$0x1]  ;;  %v327_v4 = vld [vmem:[%s1733_s28 + $0xaa] sm:$0x1] }
  0x89   : > { %v501_v5 = vsel %vm472_vm6, %v500_v31, %v499_v34  ;;  %v979_v6 = vsel %vm460_vm2, %v978_v55, %v977_v56  ;;  %v328_v7 = vld [vmem:[%s1733_s28 + $0xac] sm:$0x1]  ;;  %v329_v8 = vld [vmem:[%s1733_s28 + $0xae] sm:$0x1]  ;;  %v600_v9 = vrot.slane %v323_v1, 7  ;;  %v602_v10 = vrot.slane %v324_v2, 6 }
  0x8a   : > { %677 = vmatmul.f32.gmra.mxu0 %v501_v5  ;;  %v981_v11 = vsel %vm463_vm3, %v980_v58, %v979_v6  ;;  %v604_v12 = vrot.slane %v325_v52, 5  ;;  %v606_v13 = vrot.slane %v326_v3, 4  ;;  %v608_v15 = vrot.slane %v327_v4, 3  ;;  %v804_v17 = vld [vmem:[%s1733_s28 + $0xa1] sm:$0x1] }
  0x8b   : > { %v983_v18 = vsel %vm466_vm4, %v982_v59, %v981_v11  ;;  %v601_v19 = vsel %vm454_vm0, %v600_v9, %v322_v60  ;;  %v610_v20 = vrot.slane %v328_v7, 2  ;;  %v612_v21 = vrot.slane %v329_v8, 1  ;;  %v805_v22 = vld [vmem:[%s1733_s28 + $0xa3] sm:$0x1]  ;;  %v806_v23 = vld [vmem:[%s1733_s28 + $0xa5] sm:$0x1] }
  0x8c   : > { %v985_v25 = vsel %vm469_vm5, %v984_v63, %v983_v18  ;;  %v603_v26 = vsel %vm457_vm1, %v602_v10, %v601_v19  ;;  %v807_v27 = vld [vmem:[%s1733_s28 + $0xa7] sm:$0x1]  ;;  %v808_v28 = vld [vmem:[%s1733_s28 + $0xa9] sm:$0x1]  ;;  %v809_v30 = vld [vmem:[%s1733_s28 + $0xab] sm:$0x1] }
  0x8d   : > { %v987_v32 = vsel %vm472_vm6, %v986_v0, %v985_v25  ;;  %v605_v24 = vsel %vm460_vm2, %v604_v12, %v603_v26  ;;  %v810_v14 = vld [vmem:[%s1733_s28 + $0xad] sm:$0x1]  ;;  %v811_v29 = vld [vmem:[%s1733_s28 + $0xaf] sm:$0x1]  ;;  %v1072_v33 = vrot.slane %v805_v22, 7  ;;  %v1074_v35 = vrot.slane %v806_v23, 6 }
  0x8e   : > { %1152 = vmatmul.f32.gmra.mxu1 %v987_v32  ;;  %v607_v36 = vsel %vm463_vm3, %v606_v13, %v605_v24  ;;  %v1076_v37 = vrot.slane %v807_v27, 5  ;;  %v1078_v38 = vrot.slane %v808_v28, 4  ;;  %v1080_v39 = vrot.slane %v809_v30, 3  ;;  %v266_v40 = vld [vmem:[%s1733_s28 + $0x30] sm:$0x1] }
  0x8f   : > { %v609_v41 = vsel %vm466_vm4, %v608_v15, %v607_v36  ;;  %v1073_v31 = vsel %vm454_vm0, %v1072_v33, %v804_v17  ;;  %v1082_v42 = vrot.slane %v810_v14, 2  ;;  %v1084_v43 = vrot.slane %v811_v29, 1  ;;  %v267_v44 = vld [vmem:[%s1733_s28 + $0x32] sm:$0x1]  ;;  %v268_v45 = vld [vmem:[%s1733_s28 + $0x34] sm:$0x1] }
  0x90   : > { %v611_v46 = vsel %vm469_vm5, %v610_v20, %v609_v41  ;;  %v1075_v47 = vsel %vm457_vm1, %v1074_v35, %v1073_v31  ;;  %v269_v48 = vld [vmem:[%s1733_s28 + $0x36] sm:$0x1]  ;;  %v270_v57 = vld [vmem:[%s1733_s28 + $0x38] sm:$0x1]  ;;  %v271_v16 = vld [vmem:[%s1733_s28 + $0x3a] sm:$0x1] }
  0x91   : > { %v613_v49 = vsel %vm472_vm6, %v612_v21, %v611_v46  ;;  %v1077_v50 = vsel %vm460_vm2, %v1076_v37, %v1075_v47  ;;  %v272_v51 = vld [vmem:[%s1733_s28 + $0x3c] sm:$0x1]  ;;  %v273_v53 = vld [vmem:[%s1733_s28 + $0x3e] sm:$0x1]  ;;  %v502_v54 = vrot.slane %v267_v44, 7  ;;  %v504_v55 = vrot.slane %v268_v45, 6 }
  0x92   : > { %701 = vmatmul.f32.gmra.mxu2 %v613_v49  ;;  %v1079_v58 = vsel %vm463_vm3, %v1078_v38, %v1077_v50  ;;  %v506_v59 = vrot.slane %v269_v48, 5  ;;  %v508_v60 = vrot.slane %v270_v57, 4  ;;  %v510_v61 = vrot.slane %v271_v16, 3  ;;  %v756_v62 = vld [vmem:[%s1733_s28 + $0x41] sm:$0x1] }
  0x93   : > { %v1081_v63 = vsel %vm466_vm4, %v1080_v39, %v1079_v58  ;;  %v503_v0 = vsel %vm454_vm0, %v502_v54, %v266_v40  ;;  %v512_v1 = vrot.slane %v272_v51, 2  ;;  %v514_v2 = vrot.slane %v273_v53, 1  ;;  %v757_v34 = vld [vmem:[%s1733_s28 + $0x43] sm:$0x1]  ;;  %v758_v56 = vld [vmem:[%s1733_s28 + $0x45] sm:$0x1] }
  0x94   : > { %v1083_v52 = vsel %vm469_vm5, %v1082_v42, %v1081_v63  ;;  %v505_v3 = vsel %vm457_vm1, %v504_v55, %v503_v0  ;;  %v759_v4 = vld [vmem:[%s1733_s28 + $0x47] sm:$0x1]  ;;  %v760_v5 = vld [vmem:[%s1733_s28 + $0x49] sm:$0x1]  ;;  %v761_v6 = vld [vmem:[%s1733_s28 + $0x4b] sm:$0x1] }
  0x95   : > { %v1085_v7 = vsel %vm472_vm6, %v1084_v43, %v1083_v52  ;;  %v507_v8 = vsel %vm460_vm2, %v506_v59, %v505_v3  ;;  %v762_v9 = vld [vmem:[%s1733_s28 + $0x4d] sm:$0x1]  ;;  %v763_v10 = vld [vmem:[%s1733_s28 + $0x4f] sm:$0x1]  ;;  %v988_v11 = vrot.slane %v757_v34, 7  ;;  %v990_v12 = vrot.slane %v758_v56, 6 }
  0x96   : > { %1173 = vmatmul.f32.gmra.mxu3 %v1085_v7  ;;  %v509_v13 = vsel %vm463_vm3, %v508_v60, %v507_v8  ;;  %v992_v15 = vrot.slane %v759_v4, 5  ;;  %v994_v17 = vrot.slane %v760_v5, 4  ;;  %v996_v18 = vrot.slane %v761_v6, 3  ;;  %v330_v19 = vld [vmem:[%s1733_s28 + $0xb0] sm:$0x1] }
  0x97   : > { %v511_v20 = vsel %vm466_vm4, %v510_v61, %v509_v13  ;;  %v989_v21 = vsel %vm454_vm0, %v988_v11, %v756_v62  ;;  %v998_v22 = vrot.slane %v762_v9, 2  ;;  %v1000_v23 = vrot.slane %v763_v10, 1  ;;  %v331_v25 = vld [vmem:[%s1733_s28 + $0xb2] sm:$0x1]  ;;  %v332_v26 = vld [vmem:[%s1733_s28 + $0xb4] sm:$0x1] }
  0x98   : > { %v513_v27 = vsel %vm469_vm5, %v512_v1, %v511_v20  ;;  %v991_v28 = vsel %vm457_vm1, %v990_v12, %v989_v21  ;;  %v333_v30 = vld [vmem:[%s1733_s28 + $0xb6] sm:$0x1]  ;;  %v334_v32 = vld [vmem:[%s1733_s28 + $0xb8] sm:$0x1]  ;;  %v335_v24 = vld [vmem:[%s1733_s28 + $0xba] sm:$0x1] }
  0x99   : > { %v515_v14 = vsel %vm472_vm6, %v514_v2, %v513_v27  ;;  %v993_v29 = vsel %vm460_vm2, %v992_v15, %v991_v28  ;;  %v336_v33 = vld [vmem:[%s1733_s28 + $0xbc] sm:$0x1]  ;;  %v337_v35 = vld [vmem:[%s1733_s28 + $0xbe] sm:$0x1]  ;;  %v614_v36 = vrot.slane %v331_v25, 7  ;;  %v616_v37 = vrot.slane %v332_v26, 6 }
  0x9a   : > { %680 = vmatmul.f32.gmra.mxu0 %v515_v14  ;;  %v995_v38 = vsel %vm463_vm3, %v994_v17, %v993_v29  ;;  %v618_v39 = vrot.slane %v333_v30, 5  ;;  %v620_v40 = vrot.slane %v334_v32, 4  ;;  %v622_v41 = vrot.slane %v335_v24, 3  ;;  %v812_v31 = vld [vmem:[%s1733_s28 + $0xb1] sm:$0x1] }
  0x9b   : > { %v997_v42 = vsel %vm466_vm4, %v996_v18, %v995_v38  ;;  %v615_v43 = vsel %vm454_vm0, %v614_v36, %v330_v19  ;;  %v624_v44 = vrot.slane %v336_v33, 2  ;;  %v626_v45 = vrot.slane %v337_v35, 1  ;;  %v813_v46 = vld [vmem:[%s1733_s28 + $0xb3] sm:$0x1]  ;;  %v814_v47 = vld [vmem:[%s1733_s28 + $0xb5] sm:$0x1] }
  0x9c   : > { %v999_v48 = vsel %vm469_vm5, %v998_v22, %v997_v42  ;;  %v617_v57 = vsel %vm457_vm1, %v616_v37, %v615_v43  ;;  %v815_v16 = vld [vmem:[%s1733_s28 + $0xb7] sm:$0x1]  ;;  %v816_v49 = vld [vmem:[%s1733_s28 + $0xb9] sm:$0x1]  ;;  %v817_v50 = vld [vmem:[%s1733_s28 + $0xbb] sm:$0x1] }
  0x9d   : > { %v1001_v51 = vsel %vm472_vm6, %v1000_v23, %v999_v48  ;;  %v619_v53 = vsel %vm460_vm2, %v618_v39, %v617_v57  ;;  %v818_v54 = vld [vmem:[%s1733_s28 + $0xbd] sm:$0x1]  ;;  %v819_v55 = vld [vmem:[%s1733_s28 + $0xbf] sm:$0x1]  ;;  %v1086_v58 = vrot.slane %v813_v46, 7  ;;  %v1088_v59 = vrot.slane %v814_v47, 6 }
  0x9e   : > { %1155 = vmatmul.f32.gmra.mxu1 %v1001_v51  ;;  %v621_v60 = vsel %vm463_vm3, %v620_v40, %v619_v53  ;;  %v1090_v61 = vrot.slane %v815_v16, 5  ;;  %v1092_v62 = vrot.slane %v816_v49, 4  ;;  %v1094_v63 = vrot.slane %v817_v50, 3  ;;  %v274_v0 = vld [vmem:[%s1733_s28 + $0x40] sm:$0x1] }
  0x9f   : > { %v623_v1 = vsel %vm466_vm4, %v622_v41, %v621_v60  ;;  %v1087_v2 = vsel %vm454_vm0, %v1086_v58, %v812_v31  ;;  %v1096_v34 = vrot.slane %v818_v54, 2  ;;  %v1098_v56 = vrot.slane %v819_v55, 1  ;;  %v275_v52 = vld [vmem:[%s1733_s28 + $0x42] sm:$0x1]  ;;  %v276_v3 = vld [vmem:[%s1733_s28 + $0x44] sm:$0x1] }
  0xa0   : > { %v625_v4 = vsel %vm469_vm5, %v624_v44, %v623_v1  ;;  %v1089_v5 = vsel %vm457_vm1, %v1088_v59, %v1087_v2  ;;  %v277_v6 = vld [vmem:[%s1733_s28 + $0x46] sm:$0x1]  ;;  %v278_v7 = vld [vmem:[%s1733_s28 + $0x48] sm:$0x1]  ;;  %v279_v8 = vld [vmem:[%s1733_s28 + $0x4a] sm:$0x1] }
  0xa1   : > { %v627_v9 = vsel %vm472_vm6, %v626_v45, %v625_v4  ;;  %v1091_v10 = vsel %vm460_vm2, %v1090_v61, %v1089_v5  ;;  %v280_v11 = vld [vmem:[%s1733_s28 + $0x4c] sm:$0x1]  ;;  %v281_v12 = vld [vmem:[%s1733_s28 + $0x4e] sm:$0x1]  ;;  %v516_v13 = vrot.slane %v275_v52, 7  ;;  %v518_v15 = vrot.slane %v276_v3, 6 }
  0xa2   : > { %704 = vmatmul.f32.gmra.mxu2 %v627_v9  ;;  %v1093_v17 = vsel %vm463_vm3, %v1092_v62, %v1091_v10  ;;  %v520_v18 = vrot.slane %v277_v6, 5  ;;  %v522_v19 = vrot.slane %v278_v7, 4  ;;  %v524_v20 = vrot.slane %v279_v8, 3  ;;  %v764_v21 = vld [vmem:[%s1733_s28 + $0x51] sm:$0x1] }
  0xa3   : > { %v1095_v22 = vsel %vm466_vm4, %v1094_v63, %v1093_v17  ;;  %v517_v23 = vsel %vm454_vm0, %v516_v13, %v274_v0  ;;  %v526_v25 = vrot.slane %v280_v11, 2  ;;  %v528_v26 = vrot.slane %v281_v12, 1  ;;  %v765_v27 = vld [vmem:[%s1733_s28 + $0x53] sm:$0x1]  ;;  %v766_v28 = vld [vmem:[%s1733_s28 + $0x55] sm:$0x1] }
  0xa4   : > { %v1097_v30 = vsel %vm469_vm5, %v1096_v34, %v1095_v22  ;;  %v519_v32 = vsel %vm457_vm1, %v518_v15, %v517_v23  ;;  %v767_v24 = vld [vmem:[%s1733_s28 + $0x57] sm:$0x1]  ;;  %v768_v14 = vld [vmem:[%s1733_s28 + $0x59] sm:$0x1]  ;;  %v769_v29 = vld [vmem:[%s1733_s28 + $0x5b] sm:$0x1] }
  0xa5   : > { %v1099_v33 = vsel %vm472_vm6, %v1098_v56, %v1097_v30  ;;  %v521_v35 = vsel %vm460_vm2, %v520_v18, %v519_v32  ;;  %v770_v36 = vld [vmem:[%s1733_s28 + $0x5d] sm:$0x1]  ;;  %v771_v37 = vld [vmem:[%s1733_s28 + $0x5f] sm:$0x1]  ;;  %v1002_v38 = vrot.slane %v765_v27, 7  ;;  %v1004_v39 = vrot.slane %v766_v28, 6 }
  0xa6   : > { %1176 = vmatmul.f32.gmra.mxu3 %v1099_v33  ;;  %v523_v40 = vsel %vm463_vm3, %v522_v19, %v521_v35  ;;  %v1006_v41 = vrot.slane %v767_v24, 5  ;;  %v1008_v31 = vrot.slane %v768_v14, 4  ;;  %v1010_v42 = vrot.slane %v769_v29, 3  ;;  %v338_v43 = vld [vmem:[%s1733_s28 + $0xc0] sm:$0x1] }
  0xa7   : > { %v525_v44 = vsel %vm466_vm4, %v524_v20, %v523_v40  ;;  %v1003_v45 = vsel %vm454_vm0, %v1002_v38, %v764_v21  ;;  %v1012_v46 = vrot.slane %v770_v36, 2  ;;  %v1014_v47 = vrot.slane %v771_v37, 1  ;;  %v339_v48 = vld [vmem:[%s1733_s28 + $0xc2] sm:$0x1]  ;;  %v340_v57 = vld [vmem:[%s1733_s28 + $0xc4] sm:$0x1] }
  0xa8   : > { %v527_v16 = vsel %vm469_vm5, %v526_v25, %v525_v44  ;;  %v1005_v49 = vsel %vm457_vm1, %v1004_v39, %v1003_v45  ;;  %v341_v50 = vld [vmem:[%s1733_s28 + $0xc6] sm:$0x1]  ;;  %v342_v51 = vld [vmem:[%s1733_s28 + $0xc8] sm:$0x1]  ;;  %v343_v53 = vld [vmem:[%s1733_s28 + $0xca] sm:$0x1] }
  0xa9   : > { %v529_v54 = vsel %vm472_vm6, %v528_v26, %v527_v16  ;;  %v1007_v55 = vsel %vm460_vm2, %v1006_v41, %v1005_v49  ;;  %v344_v58 = vld [vmem:[%s1733_s28 + $0xcc] sm:$0x1]  ;;  %v345_v59 = vld [vmem:[%s1733_s28 + $0xce] sm:$0x1]  ;;  %v628_v60 = vrot.slane %v339_v48, 7  ;;  %v630_v61 = vrot.slane %v340_v57, 6 }
  0xaa   : > { %683 = vmatmul.f32.gmra.mxu0 %v529_v54  ;;  %v1009_v62 = vsel %vm463_vm3, %v1008_v31, %v1007_v55  ;;  %v632_v63 = vrot.slane %v341_v50, 5  ;;  %v634_v0 = vrot.slane %v342_v51, 4  ;;  %v636_v1 = vrot.slane %v343_v53, 3  ;;  %v820_v2 = vld [vmem:[%s1733_s28 + $0xc1] sm:$0x1] }
  0xab   : > { %v1011_v34 = vsel %vm466_vm4, %v1010_v42, %v1009_v62  ;;  %v629_v56 = vsel %vm454_vm0, %v628_v60, %v338_v43  ;;  %v638_v52 = vrot.slane %v344_v58, 2  ;;  %v640_v3 = vrot.slane %v345_v59, 1  ;;  %v821_v4 = vld [vmem:[%s1733_s28 + $0xc3] sm:$0x1]  ;;  %v822_v5 = vld [vmem:[%s1733_s28 + $0xc5] sm:$0x1] }
  0xac   : > { %v1013_v6 = vsel %vm469_vm5, %v1012_v46, %v1011_v34  ;;  %v631_v7 = vsel %vm457_vm1, %v630_v61, %v629_v56  ;;  %v823_v8 = vld [vmem:[%s1733_s28 + $0xc7] sm:$0x1]  ;;  %v824_v9 = vld [vmem:[%s1733_s28 + $0xc9] sm:$0x1]  ;;  %v825_v10 = vld [vmem:[%s1733_s28 + $0xcb] sm:$0x1] }
  0xad   : > { %v1015_v11 = vsel %vm472_vm6, %v1014_v47, %v1013_v6  ;;  %v633_v12 = vsel %vm460_vm2, %v632_v63, %v631_v7  ;;  %v826_v13 = vld [vmem:[%s1733_s28 + $0xcd] sm:$0x1]  ;;  %v827_v15 = vld [vmem:[%s1733_s28 + $0xcf] sm:$0x1]  ;;  %v1100_v17 = vrot.slane %v821_v4, 7  ;;  %v1102_v18 = vrot.slane %v822_v5, 6 }
  0xae   : > { %1158 = vmatmul.f32.gmra.mxu1 %v1015_v11  ;;  %v635_v19 = vsel %vm463_vm3, %v634_v0, %v633_v12  ;;  %v1104_v20 = vrot.slane %v823_v8, 5  ;;  %v1106_v21 = vrot.slane %v824_v9, 4  ;;  %v1108_v22 = vrot.slane %v825_v10, 3  ;;  %v282_v23 = vld [vmem:[%s1733_s28 + $0x50] sm:$0x1] }
  0xaf   : > { %v637_v25 = vsel %vm466_vm4, %v636_v1, %v635_v19  ;;  %v1101_v26 = vsel %vm454_vm0, %v1100_v17, %v820_v2  ;;  %v1110_v27 = vrot.slane %v826_v13, 2  ;;  %v1112_v28 = vrot.slane %v827_v15, 1  ;;  %v283_v30 = vld [vmem:[%s1733_s28 + $0x52] sm:$0x1]  ;;  %v284_v32 = vld [vmem:[%s1733_s28 + $0x54] sm:$0x1] }
  0xb0   : > { %v639_v24 = vsel %vm469_vm5, %v638_v52, %v637_v25  ;;  %v1103_v14 = vsel %vm457_vm1, %v1102_v18, %v1101_v26  ;;  %v285_v29 = vld [vmem:[%s1733_s28 + $0x56] sm:$0x1]  ;;  %v286_v33 = vld [vmem:[%s1733_s28 + $0x58] sm:$0x1]  ;;  %v287_v35 = vld [vmem:[%s1733_s28 + $0x5a] sm:$0x1] }
  0xb1   : > { %v641_v36 = vsel %vm472_vm6, %v640_v3, %v639_v24  ;;  %v1105_v37 = vsel %vm460_vm2, %v1104_v20, %v1103_v14  ;;  %v288_v38 = vld [vmem:[%s1733_s28 + $0x5c] sm:$0x1]  ;;  %v289_v39 = vld [vmem:[%s1733_s28 + $0x5e] sm:$0x1]  ;;  %v530_v40 = vrot.slane %v283_v30, 7  ;;  %v532_v41 = vrot.slane %v284_v32, 6 }
  0xb2   : > { %707 = vmatmul.f32.gmra.mxu2 %v641_v36  ;;  %v1107_v31 = vsel %vm463_vm3, %v1106_v21, %v1105_v37  ;;  %v534_v42 = vrot.slane %v285_v29, 5  ;;  %v536_v43 = vrot.slane %v286_v33, 4  ;;  %v538_v44 = vrot.slane %v287_v35, 3  ;;  %v772_v45 = vld [vmem:[%s1733_s28 + $0x61] sm:$0x1] }
  0xb3   : > { %v1109_v46 = vsel %vm466_vm4, %v1108_v22, %v1107_v31  ;;  %v531_v47 = vsel %vm454_vm0, %v530_v40, %v282_v23  ;;  %v540_v48 = vrot.slane %v288_v38, 2  ;;  %v542_v57 = vrot.slane %v289_v39, 1  ;;  %v773_v16 = vld [vmem:[%s1733_s28 + $0x63] sm:$0x1]  ;;  %v774_v49 = vld [vmem:[%s1733_s28 + $0x65] sm:$0x1] }
  0xb4   : > { %v1111_v50 = vsel %vm469_vm5, %v1110_v27, %v1109_v46  ;;  %v533_v51 = vsel %vm457_vm1, %v532_v41, %v531_v47  ;;  %v775_v53 = vld [vmem:[%s1733_s28 + $0x67] sm:$0x1]  ;;  %v776_v54 = vld [vmem:[%s1733_s28 + $0x69] sm:$0x1]  ;;  %v777_v55 = vld [vmem:[%s1733_s28 + $0x6b] sm:$0x1] }
  0xb5   : > { %v1113_v58 = vsel %vm472_vm6, %v1112_v28, %v1111_v50  ;;  %v535_v59 = vsel %vm460_vm2, %v534_v42, %v533_v51  ;;  %v778_v60 = vld [vmem:[%s1733_s28 + $0x6d] sm:$0x1]  ;;  %v1016_v61 = vrot.slane %v773_v16, 7  ;;  %v1018_v62 = vrot.slane %v774_v49, 6  ;;  %v779_v0 = vld [vmem:[%s1733_s28 + $0x6f] sm:$0x1] }
  0xb6   : > { %1179 = vmatmul.f32.gmra.mxu3 %v1113_v58  ;;  %v537_v63 = vsel %vm463_vm3, %v536_v43, %v535_v59  ;;  %v1020_v1 = vrot.slane %v775_v53, 5  ;;  %v1022_v2 = vrot.slane %v776_v54, 4  ;;  %v1024_v52 = vrot.slane %v777_v55, 3  ;;  %v2179_v13 = vld [vmem:[%s2281_s2] ss:$0 sm:$0xff] }
  0xb7   : > { %v539_v34 = vsel %vm466_vm4, %v538_v44, %v537_v63  ;;  %v1017_v56 = vsel %vm454_vm0, %v1016_v61, %v772_v45  ;;  %v1026_v5 = vrot.slane %v778_v60, 2  ;;  %v1028_v8 = vrot.slane %v779_v0, 1 }
  0xb8   : > { %v541_v3 = vsel %vm469_vm5, %v540_v48, %v539_v34  ;;  %v1019_v4 = vsel %vm457_vm1, %v1018_v62, %v1017_v56 }
  0xb9   : > { %v543_v6 = vsel %vm472_vm6, %v542_v57, %v541_v3  ;;  %v1021_v7 = vsel %vm460_vm2, %v1020_v1, %v1019_v4 }
  0xba   : > { %686 = vmatmul.f32.gmra.mxu0 %v543_v6  ;;  %v1023_v9 = vsel %vm463_vm3, %v1022_v2, %v1021_v7 }
  0xbb   : > { %v1025_v10 = vsel %vm466_vm4, %v1024_v52, %v1023_v9 }
  0xbc   : > { %v1027_v11 = vsel %vm469_vm5, %v1026_v5, %v1025_v10 }
  0xbd   : > { %v1029_v12 = vsel %vm472_vm6, %v1028_v8, %v1027_v11 }
  0xbe   : > { %1161 = vmatmul.f32.gmra.mxu1 %v1029_v12 }
  0xe8   : > { %v1144_v15 = vpop.f32.mrf.mxu1 }
  0xe9   : > { %v1145_v17 = vadd.f32 %v2179_v13, %v1144_v15 }
  0xea   : > { %v672_v18 = vpop.f32.mrf.mxu0 }
  0xeb   : > { %1338 = vst [vmem:[%s2184_s10 + $0x68] sm:$0xff] %v1145_v17  ;;  %v673_v19 = vadd.f32 %v2179_v13, %v672_v18 }
  0xed   : > { %711 = vst [vmem:[%s2184_s10] sm:$0xff] %v673_v19 }
  0xee   : > { %v690_v20 = vpop.f32.mrf.mxu2 }
  0xef   : > { %v691_v21 = vadd.f32 %v2179_v13, %v690_v20 }
  0xf0   : > { %v1147_v22 = vpop.f32.mrf.mxu1  ;;  %v1165_v23 = vpop.f32.mrf.mxu3 }
  0xf1   : > { %717 = vst [vmem:[%s2184_s10 + $0x30] sm:$0xff] %v691_v21  ;;  %v1148_v25 = vadd.f32 %v2179_v13, %v1147_v22  ;;  %v1166_v26 = vadd.f32 %v2179_v13, %v1165_v23 }
  0xf3   : > { %1339 = vst [vmem:[%s2184_s10 + $0x70] sm:$0xff] %v1148_v25 }
  0xf4   : > { %1345 = vst [vmem:[%s2184_s10 + $0xa0] sm:$0xff] %v1166_v26 }
  0xf6   : > { %v693_v27 = vpop.f32.mrf.mxu2 }
  0xf7   : > { %v694_v28 = vadd.f32 %v2179_v13, %v693_v27  ;;  %v675_v30 = vpop.f32.mrf.mxu0 }
  0xf8   : > { %v676_v32 = vadd.f32 %v2179_v13, %v675_v30 }
  0xf9   : > { %718 = vst [vmem:[%s2184_s10 + $0x38] sm:$0xff] %v694_v28  ;;  %v1168_v24 = vpop.f32.mrf.mxu3 }
  0xfa   : > { %712 = vst [vmem:[%s2184_s10 + $0x8] sm:$0xff] %v676_v32  ;;  %v1169_v14 = vadd.f32 %v2179_v13, %v1168_v24 }
  0xfb   : > { %v1150_v29 = vpop.f32.mrf.mxu1 }
  0xfc   : > { %v1151_v35 = vadd.f32 %v2179_v13, %v1150_v29  ;;  %1346 = vst [vmem:[%s2184_s10 + $0xa8] sm:$0xff] %v1169_v14 }
  0xfe   : > { %v696_v33 = vpop.f32.mrf.mxu2  ;;  %1340 = vst [vmem:[%s2184_s10 + $0x78] sm:$0xff] %v1151_v35 }
  0xff   : > { %v697_v36 = vadd.f32 %v2179_v13, %v696_v33 }
 0x101   : > { %719 = vst [vmem:[%s2184_s10 + $0x40] sm:$0xff] %v697_v36 }
 0x106   : > { %v699_v37 = vpop.f32.mrf.mxu2 }
 0x107   : > { %v700_v38 = vadd.f32 %v2179_v13, %v699_v37  ;;  %v678_v39 = vpop.f32.mrf.mxu0 }
 0x108   : > { %v679_v40 = vadd.f32 %v2179_v13, %v678_v39 }
 0x109   : > { %720 = vst [vmem:[%s2184_s10 + $0x48] sm:$0xff] %v700_v38  ;;  %v1171_v41 = vpop.f32.mrf.mxu3 }
 0x10a   : > { %713 = vst [vmem:[%s2184_s10 + $0x10] sm:$0xff] %v679_v40  ;;  %v1172_v31 = vadd.f32 %v2179_v13, %v1171_v41 }
 0x10b   : > { %v1153_v42 = vpop.f32.mrf.mxu1 }
 0x10c   : > { %v1154_v43 = vadd.f32 %v2179_v13, %v1153_v42  ;;  %1347 = vst [vmem:[%s2184_s10 + $0xb0] sm:$0xff] %v1172_v31 }
 0x10e   : > { %1341 = vst [vmem:[%s2184_s10 + $0x80] sm:$0xff] %v1154_v43 }
 0x115   : > { %v702_v44 = vpop.f32.mrf.mxu2 }
 0x116   : > { %v703_v45 = vadd.f32 %v2179_v13, %v702_v44 }
 0x117   : > { %v681_v46 = vpop.f32.mrf.mxu0 }
 0x118   : > { %v682_v47 = vadd.f32 %v2179_v13, %v681_v46  ;;  %721 = vst [vmem:[%s2184_s10 + $0x50] sm:$0xff] %v703_v45 }
 0x119   : > { %v1174_v48 = vpop.f32.mrf.mxu3 }
 0x11a   : > { %714 = vst [vmem:[%s2184_s10 + $0x18] sm:$0xff] %v682_v47  ;;  %v1175_v57 = vadd.f32 %v2179_v13, %v1174_v48 }
 0x11b   : > { %v1156_v16 = vpop.f32.mrf.mxu1 }
 0x11c   : > { %v1157_v49 = vadd.f32 %v2179_v13, %v1156_v16  ;;  %1348 = vst [vmem:[%s2184_s10 + $0xb8] sm:$0xff] %v1175_v57 }
 0x11e   : > { %1342 = vst [vmem:[%s2184_s10 + $0x88] sm:$0xff] %v1157_v49 }
 0x125   : > { %v705_v50 = vpop.f32.mrf.mxu2 }
 0x126   : > { %v706_v51 = vadd.f32 %v2179_v13, %v705_v50 }
 0x127   : > { %v684_v53 = vpop.f32.mrf.mxu0 }
 0x128   : > { %v685_v54 = vadd.f32 %v2179_v13, %v684_v53  ;;  %722 = vst [vmem:[%s2184_s10 + $0x58] sm:$0xff] %v706_v51 }
 0x129   : > { %v1177_v55 = vpop.f32.mrf.mxu3 }
 0x12a   : > { %715 = vst [vmem:[%s2184_s10 + $0x20] sm:$0xff] %v685_v54  ;;  %v1178_v58 = vadd.f32 %v2179_v13, %v1177_v55 }
 0x12b   : > { %v1159_v59 = vpop.f32.mrf.mxu1 }
 0x12c   : > { %v1160_v60 = vadd.f32 %v2179_v13, %v1159_v59  ;;  %1349 = vst [vmem:[%s2184_s10 + $0xc0] sm:$0xff] %v1178_v58 }
 0x12e   : > { %1343 = vst [vmem:[%s2184_s10 + $0x90] sm:$0xff] %v1160_v60 }
 0x135   : > { %v708_v61 = vpop.f32.mrf.mxu2 }
 0x136   : > { %v709_v62 = vadd.f32 %v2179_v13, %v708_v61 }
 0x137   : > { %v687_v63 = vpop.f32.mrf.mxu0 }
 0x138   : > { %v688_v0 = vadd.f32 %v2179_v13, %v687_v63  ;;  %723 = vst [vmem:[%s2184_s10 + $0x60] sm:$0xff] %v709_v62 }
 0x139   : > { %v1180_v1 = vpop.f32.mrf.mxu3 }
 0x13a   : > { %716 = vst [vmem:[%s2184_s10 + $0x28] sm:$0xff] %v688_v0  ;;  %v1181_v2 = vadd.f32 %v2179_v13, %v1180_v1  ;;  %1204 = sbr.rel (!%p1655_p11) target bundleno = 338 (0x152), region = 44 }
 0x13b   : > { %v1162_v34 = vpop.f32.mrf.mxu1 }
 0x13c   : > { %v1163_v56 = vadd.f32 %v2179_v13, %v1162_v34  ;;  %1350 = vst [vmem:[%s2184_s10 + $0xc8] sm:$0xff] %v1181_v2 }
 0x13e   : > { %1344 = vst [vmem:[%s2184_s10 + $0x98] sm:$0xff] %v1163_v56 }
 0x13f   : > { %s1205_s22 = smul.u32 13, %s1624_s16 }
 0x141   : > { %s1206_s29 = ssub.s32 25, %s1205_s22 }
 0x142   : > { %p1207_p6 = scmp.lt.s32.totalorder %s1206_s29, 13 }
 0x144   : > { %s2303_s29 = smov (!%p1207_p6, %s1206_s29), 13 }
 0x145   : > { %s1351_s30 = sshll.u32 %s2303_s29, 4 }
 0x146   : > { %s1210_s7 = ssub.s32 208, %s1351_s30 }
 0x147   : > { %s1211_s5 = sshll.u32 %s1210_s7, 4 }
 0x148   : > { %1212 = vsyncadd %s1198_s20, %s1211_s5  ;;  %p2246_p13 = scmp.ne.s32.totalorder %s1351_s30, 0  ;;  %s1360_s6 = smul.u32 104, %s1624_s16 }
 0x149   : > { %s1228_s17 = sshll.u32 %s2184_s10, 4  ;;  %s1362_s19 = sshll.u32 %s2303_s29, 8  ;;  %s1229_s17 = int_to_ptr.vmem [resolvable:$true] %s1228_s17 }
 0x14a   : > { %s1215_s27 = scalar_lea.hbm %s2282_s3, %s1360_s6  ;;  %s1577_s28 = smov 1664  }
 0x14b   : > { %s1230_s4 = sshll.u32 %s1215_s27, 4  ;;  %1237 = sst [smem:[#allocation9]] %s1577_s28  ;;  %s1231_s4 = int_to_ptr.hbm [resolvable:$true] %s1230_s4 }
 0x14c   : > { %1241 = sst [smem:[#allocation9 + $0x2]] %s2303_s29  ;;  %s1578_s23 = smov 3200  }
 0x14d   : > { %1239 = sst [smem:[#allocation9 + $0x1]] %s1578_s23  ;;  %s1579_s26 = smov 128  }
 0x14e   : > { %1243 = sst [smem:[#allocation9 + $0x3]] %s1579_s26  ;;  %s1580_s16 = smov 8  }
 0x14f   : > { %1245 = sst [smem:[#allocation9 + $0x4]] %s1579_s26  ;;  %s1581_s10 = smov [#allocation8]  }
 0x150   : > { %1247 = sst [smem:[#allocation9 + $0x5]] %s1580_s16  ;;  %s1582_s22 = smov 0  }
 0x151   : > { %1249 = dma.general (%p2246_p13), %s1229_s17, %s1362_s19, %s1231_s4, %s1198_s20, %s1581_s10, [#allocation9], %s1582_s22, 0  }
 0x152 PF: > { %s1258_s30 = sand.u32 1, %s1557_s12   ;;  %p2294_p11 = scmp.ne.s32.totalorder %s2288_s25, 0 }
 0x153   : > { %p2295_p2 = scmp.ge.s32.totalorder %s1569_s15, 2  ;;  %s1259_s29 = scalar_lea.sflag [#allocation4], %s1258_s30 }
 0x155   : > { %p1408_p5 = pnand %p2295_p2, %p2294_p11 }
 0x157   : > { %p1409_p9 = pneg %p1408_p5 }
 0x159   : > { %1552 = dma.done.wait (%p1409_p9), %s1259_s29, 3328  }
 0x15a   : > { %1554 = vsyncadd (%p1409_p9), %s1259_s29, 4294963968  ;;  %p17_p10 = scmp.ge.s32.totalorder %s1628_s18, 4   ;;  %s2296_s12 = smov %s1561_s13 }
 0x15b   : > { %s2297_s13 = smov %s1565_s14  ;;  %s2298_s14 = smov %s1640_s21 }
 0x15c   : > { %s2299_s15 = smov %s1628_s18  ;;  %19 = sbr.rel (!%p17_p10) target bundleno = 6 (0x6), region = 87 }
 0x161   :  { %1265 = vsyncpa [#allocation3], 1 }
 0x162   :  { %1267 = vsyncpa [#allocation3 + $0x1], 1 }
 0x163   :  { %1268 = vsyncpa [#allocation6], 1 }
 0x164   :  { %1269 = vsyncpa [#allocation4], 1 }
 0x165   :  { %1271 = vsyncpa [#allocation4 + $0x1], 1 }

</bundles_post_ra>
